<compile_context>
chip_gen: v6e
topology: v6e:2x2x1
jax: 0.10.0
libtpu: 0.0.40
codegen_flags: <defaults>
</compile_context>

<pallas_src>
import functools

import jax
import jax.numpy as jnp
from jax.experimental import pallas as pl
from jax.experimental.pallas import tpu as pltpu


_LANES = 128            # vreg lane width; each grid step writes one lane-dense slot
_MIB = 1024 * 1024


def _round8_up(x):
    return ((int(x) + 7) // 8) * 8


def _vmem_plan():
    """(kernel VMEM byte budget for tiling, vmem_limit_bytes) per TPU generation.

    Physical VMEM is 128 MiB on v5e/v6e and 64 MiB per TensorCore on v7x, while
    the default scoped limit is only 16/32/32 MiB -- so raise the limit
    explicitly and size tiles against it, leaving 1.5-2x headroom on top of the
    per-row accounting done in _pick_block_rows.
    """
    cap = 64 * _MIB  # conservative default (v7x-class) if the query is unavailable
    try:
        cap = int(getattr(pltpu.get_tpu_info(), "vmem_capacity_bytes", cap))
    except Exception:
        pass
    if cap > 64 * _MIB:                      # v5e / v6e: 128 MiB physical
        return 64 * _MIB, 96 * _MIB
    return 32 * _MIB, 48 * _MIB              # v7x: 64 MiB physical per TC


def _pick_block_rows(N, C, itemsize, vmem_budget_bytes):
    """Largest multiple-of-8 batch tile fitting the VMEM budget, capped so the
    grid keeps >= 2 blocks (v7x megacore sharding) whenever N allows it."""
    # VMEM charged per batch row of one grid step:
    #   2 x C x itemsize : logits tile, double-buffered, native dtype
    #   2 x 512 B        : targets (rows, 1) int32 block pads to 128 lanes/row, x2 bufs
    #   3 x C x 4 B      : f32 in-kernel temporaries (upcast/shifted, exp, select)
    per_row = 2 * C * itemsize + 2 * 512 + 3 * C * 4
    rows = max(8, (vmem_budget_bytes // per_row) // 8 * 8)
    # Keep nb >= 2 so the "parallel" axis can split across the two TensorCores
    # on v7x; on v5e/v6e this costs at most one extra (large) grid step.
    half = max(8, _round8_up(pl.cdiv(N, 2)))
    return min(rows, half)


def _focal_loss_kernel(logits_ref, targets_ref, out_ref, *, gamma, n_valid):
    """Per-block partial focal-loss sum.

    logits_ref : (TN, C) native dtype (f32 / bf16), full class row per block
    targets_ref: (TN, 1) int32
    out_ref    : (1, 128) f32 -- this block's partial sum, splat across lanes
    """
    i = pl.program_id(0)
    logits = logits_ref[...].astype(jnp.float32)   # f32 compute (v5e has no bf16 VPU/EUP)
    tgt = targets_ref[...]                         # (TN, 1) int32
    TN, C = logits.shape

    # Numerically-stable log-sum-exp over the class (lane) axis.
    m = jnp.max(logits, axis=-1, keepdims=True)                               # (TN, 1)
    lse = m + jnp.log(jnp.sum(jnp.exp(logits - m), axis=-1, keepdims=True))   # (TN, 1)

    # Target logit via (1, C) iota broadcast against (TN, 1) targets: no
    # tile-sized int32 temporary, no float one-hot materialization.
    classes = jax.lax.broadcasted_iota(jnp.int32, (1, C), 1)
    target_logit = jnp.sum(jnp.where(classes == tgt, logits, 0.0),
                           axis=-1, keepdims=True)                            # (TN, 1)

    ce = lse - target_logit                        # per-row cross entropy, (TN, 1)
    pt = jnp.exp(-ce)
    omp = 1.0 - pt
    # gamma is a Python float -> specialize at trace time.
    if gamma == 2.0:
        w = omp * omp                              # two VPU muls, no EUP pow
    elif gamma == 1.0:
        w = omp
    elif gamma == 0.0:
        w = jnp.ones_like(omp)
    else:
        # Guard pow(0, gamma) / pow(tiny negative, gamma) when pt rounds to >= 1.
        w = jnp.where(omp > 0.0, jnp.power(omp, jnp.float32(gamma)), 0.0)
    focal = w * ce                                 # alpha folded into the wrapper

    # Mask rows past the true batch size (ragged last block / OOB garbage rows).
    # Keep this a jnp.where select (NOT an arithmetic multiply): garbage rows may
    # hold Inf/NaN after the max/exp/log chain and NaN * 0 = NaN.
    rows = jax.lax.broadcasted_iota(jnp.int32, (TN, 1), 0) + i * TN
    partial = jnp.sum(jnp.where(rows < n_valid, focal, 0.0))

    out_ref[...] = jnp.broadcast_to(partial, (1, _LANES)).astype(jnp.float32)


def focal_loss(inputs, targets, alpha=0.25, gamma=2.0, reduction="mean",
               block_rows=None, logits_buffers=2):
    """Focal loss matching the PyTorch reference for reduction in {'mean','sum'}."""
    if reduction not in ("mean", "sum"):
        # TODO(synk): reduction='none' needs a per-row (N,) lane-dense output path.
        raise NotImplementedError("only 'mean' and 'sum' reductions are implemented")

    N, C = inputs.shape
    itemsize = jnp.dtype(inputs.dtype).itemsize
    targets2d = targets.astype(jnp.int32).reshape(N, 1)

    vmem_budget, vmem_limit = _vmem_plan()
    if block_rows is None:
        block_rows = _pick_block_rows(N, C, itemsize, vmem_budget)
    else:
        block_rows = max(8, _round8_up(block_rows))
    nb = pl.cdiv(N, block_rows)

    kernel = functools.partial(_focal_loss_kernel, gamma=float(gamma), n_valid=N)

    cost = pl.CostEstimate(
        flops=6 * N * C,
        transcendentals=N * C + 2 * N,
        bytes_accessed=N * C * itemsize + N * 4 + nb * _LANES * 4,
    )

    if logits_buffers == 2:
        logits_spec = pl.BlockSpec((block_rows, C), lambda i: (i, 0))
    else:
        # Optional deeper pipeline on the big stream; the default 2-deep buffer is
        # usually enough since per-tile compute is light relative to the DMA.
        logits_spec = pl.BlockSpec((block_rows, C), lambda i: (i, 0),
                                   pipeline_mode=pl.Buffered(logits_buffers))

    partials = pl.pallas_call(
        kernel,
        out_shape=jax.ShapeDtypeStruct((1, _LANES * nb), jnp.float32),
        grid=(nb,),
        in_specs=[
            logits_spec,
            pl.BlockSpec((block_rows, 1), lambda i: (i, 0)),   # targets tile
        ],
        out_specs=pl.BlockSpec((1, _LANES), lambda i: (0, i)),  # lane-dense partials
        compiler_params=pltpu.CompilerParams(
            dimension_semantics=("parallel",),   # blocks independent -> megacore
            vmem_limit_bytes=vmem_limit,
        ),
        cost_estimate=cost,
    )(inputs, targets2d)

    # Memory layout of (1, nb*128) is identical to (nb, 128): contiguous reduce
    # over lane 0 of each block's slot (no strided 0::128 gather).
    total = jnp.sum(partials.reshape(nb, _LANES)[:, 0])
    focal_sum = jnp.float32(alpha) * total
    if reduction == "mean":
        return focal_sum / jnp.float32(N)
    return focal_sum


def _focal_loss_ref(inputs, targets, alpha=0.25, gamma=2.0, reduction="mean"):
    # Pure-JAX reference for validation.
    logp = jax.nn.log_softmax(inputs.astype(jnp.float32), axis=-1)
    ce = -jnp.take_along_axis(logp, targets[:, None].astype(jnp.int32), axis=-1)[:, 0]
    pt = jnp.exp(-ce)
    focal = alpha * (1.0 - pt) ** gamma * ce
    return jnp.mean(focal) if reduction == "mean" else jnp.sum(focal)


if __name__ == "__main__":
    key = jax.random.PRNGKey(0)
    k1, k2, k3, k4 = jax.random.split(key, 4)

    # Small single-block case: batch=8, num_classes=32.
    N, C = 8, 32
    logits = jax.random.normal(k1, (N, C), dtype=jnp.float32)
    targets = jax.random.randint(k2, (N,), 0, C, dtype=jnp.int32)
    out = jax.block_until_ready(focal_loss(logits, targets, alpha=0.25, gamma=2.0))
    ref = _focal_loss_ref(logits, targets, alpha=0.25, gamma=2.0)
    assert jnp.allclose(out, ref, atol=1e-5, rtol=1e-5), (out, ref)

    # Auto-tiled ragged case: batch=300 -> heuristic gives a 152-row block, nb=2
    # (exercises the grid, the nb>=2 cap, and the in-kernel row mask).
    N2, C2 = 300, 32
    logits2 = jax.random.normal(k3, (N2, C2), dtype=jnp.float32)
    targets2 = jax.random.randint(k4, (N2,), 0, C2, dtype=jnp.int32)
    out2 = jax.block_until_ready(focal_loss(logits2, targets2, alpha=0.25, gamma=2.0))
    ref2 = _focal_loss_ref(logits2, targets2, alpha=0.25, gamma=2.0)
    assert jnp.allclose(out2, ref2, atol=1e-5, rtol=1e-5), (out2, ref2)

    # Explicit small blocks (nb=3, ragged last block) + 'sum' reduction.
    out3 = jax.block_until_ready(
        focal_loss(logits2, targets2, alpha=0.25, gamma=2.0, reduction="sum",
                   block_rows=128))
    ref3 = _focal_loss_ref(logits2, targets2, alpha=0.25, gamma=2.0, reduction="sum")
    assert jnp.allclose(out3, ref3, atol=1e-4, rtol=1e-5), (out3, ref3)

    print("KERNEL_OK")
</pallas_src>

<mosaic_0001>
module attributes {stable_mosaic.version = 11 : i64} {
  func.func @_focal_loss_kernel(%arg0: i32, %arg1: memref<8x32xf32, #tpu.memory_space<vmem>>, %arg2: memref<8x1xi32, #tpu.memory_space<vmem>>, %arg3: memref<1x128xf32, #tpu.memory_space<vmem>>) attributes {dimension_semantics = [#tpu.dimension_semantics<parallel>], iteration_bounds = array<i64: 1>, scalar_prefetch = 0 : i64, scratch_operands = 0 : i64, tpu.core_type = #tpu.core_type<tc>, window_params = [{transform_indices = @transform_0, window_bounds = array<i64: 8, 32>}, {transform_indices = @transform_1, window_bounds = array<i64: 8, 1>}, {transform_indices = @transform_2, window_bounds = array<i64: 1, 128>}]} {
    %c0 = arith.constant 0 : index
    %c0_0 = arith.constant 0 : index
    %0 = vector.load %arg1[%c0, %c0_0] : memref<8x32xf32, #tpu.memory_space<vmem>>, vector<8x32xf32>
    %c0_1 = arith.constant 0 : index
    %c0_2 = arith.constant 0 : index
    %1 = vector.load %arg2[%c0_1, %c0_2] : memref<8x1xi32, #tpu.memory_space<vmem>>, vector<8x1xi32>
    %cst = arith.constant dense<0xFF800000> : vector<8xf32>
    %2 = vector.multi_reduction <maximumf>, %0, %cst [1] : vector<8x32xf32> to vector<8xf32>
    %3 = vector.shape_cast %2 : vector<8xf32> to vector<8x1xf32>
    %4 = vector.broadcast %3 : vector<8x1xf32> to vector<8x32xf32>
    %5 = arith.subf %0, %4 : vector<8x32xf32>
    %6 = math.exp %5 : vector<8x32xf32>
    %cst_3 = arith.constant dense<0.000000e+00> : vector<8xf32>
    %7 = vector.multi_reduction <add>, %6, %cst_3 [1] : vector<8x32xf32> to vector<8xf32>
    %8 = vector.shape_cast %7 : vector<8xf32> to vector<8x1xf32>
    %9 = math.log %8 : vector<8x1xf32>
    %10 = arith.addf %3, %9 : vector<8x1xf32>
    %11 = tpu.iota {dimensions = array<i32: 1>} : vector<1x32xi32>
    %12 = vector.broadcast %11 : vector<1x32xi32> to vector<8x32xi32>
    %13 = vector.broadcast %1 : vector<8x1xi32> to vector<8x32xi32>
    %14 = arith.cmpi eq, %12, %13 : vector<8x32xi32>
    %cst_4 = arith.constant 0.000000e+00 : f32
    %15 = vector.broadcast %cst_4 : f32 to vector<8x32xf32>
    %16 = arith.select %14, %0, %15 : vector<8x32xi1>, vector<8x32xf32>
    %cst_5 = arith.constant dense<0.000000e+00> : vector<8xf32>
    %17 = vector.multi_reduction <add>, %16, %cst_5 [1] : vector<8x32xf32> to vector<8xf32>
    %18 = vector.shape_cast %17 : vector<8xf32> to vector<8x1xf32>
    %19 = arith.subf %10, %18 : vector<8x1xf32>
    %cst_6 = arith.constant 0.000000e+00 : f32
    %20 = vector.broadcast %cst_6 : f32 to vector<8x1xf32>
    %21 = arith.subf %20, %19 : vector<8x1xf32>
    %22 = math.exp %21 : vector<8x1xf32>
    %cst_7 = arith.constant 1.000000e+00 : f32
    %23 = vector.broadcast %cst_7 : f32 to vector<8x1xf32>
    %24 = arith.subf %23, %22 : vector<8x1xf32>
    %25 = arith.mulf %24, %24 : vector<8x1xf32>
    %26 = arith.mulf %25, %19 : vector<8x1xf32>
    %27 = tpu.iota {dimensions = array<i32: 0>} : vector<8x1xi32>
    %c8_i32 = arith.constant 8 : i32
    %28 = arith.muli %arg0, %c8_i32 : i32
    %29 = vector.broadcast %28 : i32 to vector<8x1xi32>
    %30 = arith.addi %27, %29 : vector<8x1xi32>
    %c8_i32_8 = arith.constant 8 : i32
    %31 = vector.broadcast %c8_i32_8 : i32 to vector<8x1xi32>
    %32 = arith.cmpi slt, %30, %31 : vector<8x1xi32>
    %cst_9 = arith.constant 0.000000e+00 : f32
    %33 = vector.broadcast %cst_9 : f32 to vector<8x1xf32>
    %34 = arith.select %32, %26, %33 : vector<8x1xi1>, vector<8x1xf32>
    %35 = vector.shape_cast %34 : vector<8x1xf32> to vector<1x8x1xf32>
    %cst_10 = arith.constant dense<0.000000e+00> : vector<1xf32>
    %36 = vector.multi_reduction <add>, %35, %cst_10 [1, 2] : vector<1x8x1xf32> to vector<1xf32>
    %37 = vector.shape_cast %36 : vector<1xf32> to vector<1x1x1xf32>
    %38 = vector.extract %37[0, 0, 0] : f32 from vector<1x1x1xf32>
    %39 = vector.broadcast %38 : f32 to vector<1x128xf32>
    %c0_11 = arith.constant 0 : index
    %c0_12 = arith.constant 0 : index
    %40 = vector.load %arg3[%c0_11, %c0_12] : memref<1x128xf32, #tpu.memory_space<vmem>>, vector<1x128xf32>
    tpu.vector_store %arg3[%c0_11, %c0_12], %39 {strides = array<i32>} : memref<1x128xf32, #tpu.memory_space<vmem>>, vector<1x128xf32>,
    return
  }
  func.func @transform_0(%arg0: i32) -> (i32, i32) {
    %c0_i32 = arith.constant 0 : i32
    %c0_i32_0 = arith.constant 0 : i32
    return %arg0, %c0_i32 : i32, i32
  }
  func.func @transform_1(%arg0: i32) -> (i32, i32) {
    %c0_i32 = arith.constant 0 : i32
    %c0_i32_0 = arith.constant 0 : i32
    return %arg0, %c0_i32 : i32, i32
  }
  func.func @transform_2(%arg0: i32) -> (i32, i32) {
    %c0_i32 = arith.constant 0 : i32
    %c0_i32_0 = arith.constant 0 : i32
    return %c0_i32, %arg0 : i32, i32
  }
}

</mosaic_0001>

<bundles_post_ra>
// kernel: tpu_custom_call.1
= control target key start
LH: loop header
LB: loop body
LE: loop exit
PB: predicated region body
PF: predicated region fallthrough
CT: control target
= control target key end

     0   :  { %vm14_vm0 = vcmask 261120   ;;  %s140_s0 = inlined_call_operand.vmem [shape: f32[8,32], index: 0, kind: input, shape index: {}]   ;;  %s141_s1 = inlined_call_operand.vmem [shape: s32[8,1], index: 1, kind: input, shape index: {}]   ;;  %s142_s2 = inlined_call_operand.hbm [shape: f32[1,128], index: 2, kind: output, shape index: {}]  }
   0x1   :  { %v12_v0 = vld [vmem:[%s140_s0] sm:$0xff] }
   0x2   :  { %7 = vsyncpa [#allocation3], 0  ;;  %v15_v1 = vsel %vm14_vm0, %v12_v0, -inf  ;;  %v111_v2 = vmov 0   ;;  %v13_v3 = vld [vmem:[%s141_s1] sm:$0xff]  ;;  %v27_v7 = vlaneseq  ;;  %vm51_vm2 = vcmask 7168  }
   0x3   :  { %82 = vset.pattern.permute.xlu0 %v111_v2  ;;  %s112_s0 = smov [#allocation2]  }
   0x4   :  { %16 = vmax.xlane.f32.xlu0 %v15_v1  ;;  %v28_v8 = vand.u32 127, %v27_v7  ;;  %s70_s1 = sshll.u32 %s112_s0, 4  ;;  %s71_s1 = int_to_ptr.vmem [resolvable:$true] %s70_s1 }
   0x5   :  { %s89_s14 = scalar_lea.vmem %s71_s1, 16  ;;  %s93_s15 = scalar_lea.vmem %s71_s1, 32 }
   0x6   :  { %p90_p0 = scmp.ne.s32.totalorder %s71_s1, %s89_s14  ;;  %p94_p1 = scmp.lt.s32.totalorder %s71_s1, %s71_s1 }
   0x7   :  { %p95_p2 = scmp.lt.s32.totalorder %s93_s15, %s89_s14 }
   0x9   :  { %p96_p3 = por %p95_p2, %p94_p1 }
   0xb   :  { %p97_p4 = pnand %p96_p3, %p90_p0 }
  0x1a   :  { %30 = vperm.xlu0 %82, %v13_v3  }
  0x8d   :  { %v17_v4 = vpop.xlane.xlu0 %16 }
  0x8e   :  { %v18_v5 = vsub.f32 %v12_v0, %v17_v4 }
  0x90   :  { %v19_v6 = vmul.f32 1.442695, %v18_v5 }
  0x92   :  { %83 = vpow2.f32 %v19_v6 }
  0x95   :  { %v31_v9 = vpop.permute.xlu0 %30 }
  0x96   :  { %vm32_vm1 = vcmp.eq.s32.totalorder %v28_v8, %v31_v9 }
  0x97   :  { %v33_v11 = vsel %vm32_vm1, %v12_v0, 0.0 }
  0x98   :  { %v34_v13 = vsel %vm14_vm0, %v33_v11, 0.0 }
  0x9f   :  { %v84_v10 = vpop.eup %83 }
  0xa0   :  { %v21_v12 = vsel %vm14_vm0, %v84_v10, 0.0 }
  0xa1   :  { %22 = vadd.xlane.f32.xlu1 %v21_v12 }
  0xa5   :  { %35 = vadd.xlane.f32.xlu1 %v34_v13 }
 0x12a   :  { %v23_v14 = vpop.xlane.xlu1 %22 }
 0x12b   :  { %85 = vlog2.f32 %v23_v14 }
 0x12e   :  { %v36_v17 = vpop.xlane.xlu1 %35 }
 0x138   :  { %v86_v15 = vpop.eup %85 }
 0x139   :  { %v25_v16 = vmul.f32 0.6931472, %v86_v15 }
 0x13b   :  { %v26_v18 = vadd.f32 %v25_v16, %v17_v4 }
 0x13d   :  { %v37_v19 = vsub.f32 %v26_v18, %v36_v17 }
 0x13f   :  { %v38_v20 = vsub.f32 0.0, %v37_v19 }
 0x141   :  { %v39_v21 = vmul.f32 1.442695, %v38_v20 }
 0x143   :  { %87 = vpow2.f32 %v39_v21 }
 0x150   :  { %v88_v22 = vpop.eup %87 }
 0x151   :  { %v41_v23 = vsub.f32 1.0, %v88_v22 }
 0x153   :  { %v42_v24 = vmul.f32 %v41_v23, %v41_v23 }
 0x155   :  { %v43_v25 = vmul.f32 %v42_v24, %v37_v19 }
 0x157   :  { %v52_v26 = vsel %vm51_vm2, %v43_v25, 0.0 }
 0x158   :  { %53 = vadd.xlane.f32.xlu1 %v52_v26 }
 0x1e1   :  { %v54_v27 = vpop.xlane.xlu1 %53 }
 0x1e2   :  { %v55_v28 = vrot.slane %v54_v27, 4 }
 0x1e4   :  { %v56_v29 = vadd.f32 %v55_v28, %v54_v27 }
 0x1e6   :  { %v57_v30 = vrot.slane %v56_v29, 2 }
 0x1e8   :  { %v58_v31 = vadd.f32 %v57_v30, %v56_v29 }
 0x1ea   :  { %v59_v32 = vrot.slane %v58_v31, 1 }
 0x1ec   :  { %v60_v33 = vadd.f32 %v59_v32, %v58_v31 }
 0x1ee   :  { %78 = vpush %v60_v33 }
 0x21f   :  { %s79_s13 = spop %78 }
 0x220   :  { %v62_v34 = vstv %s79_s13 }
 0x221   :  { %63 = vst [vmem:[#allocation2] sm:$0x1] %v62_v34 }
 0x222   :  { %100 = shalt.err (!%p97_p4)
}
 0x223   :  { %73 = dma.vmem_to_hbm [thread:$0]  %s71_s1, 16, %s142_s2, [#allocation3]  }
 0x224   :  { %109 = dma.done.wait [#allocation3], 16  }
 0x225   :  { %110 = vsyncadd [#allocation3], 4294967280 }
 0x226   :  { %77 = vsyncpa [#allocation3], 1 }

</bundles_post_ra>
